<compile_context>
chip_gen: v5e
topology: v5e:2x2
jax: 0.10.0
libtpu: 0.0.40
codegen_flags: <defaults>
</compile_context>

<pallas_src>
import functools
import math

import jax
import jax.numpy as jnp
from jax import lax
from jax.experimental import pallas as pl
from jax.experimental.pallas import tpu as pltpu


def _round_up(x, d):
    return (x + d - 1) // d * d


def _detect_vmem_capacity_bytes():
    """Physical VMEM per core; conservative 64 MiB fallback (v7x-sized)."""
    try:
        info = pltpu.get_tpu_info()
        for attr in ("vmem_capacity_bytes", "vmem_bytes", "vmem_size_bytes"):
            v = getattr(info, attr, None)
            if v:
                return int(v)
    except Exception:
        pass
    return 64 * 1024 * 1024


@functools.lru_cache(maxsize=1)
def _vmem_sizes():
    """(vmem_limit_bytes, working-set budget) per TPU generation."""
    cap = _detect_vmem_capacity_bytes()
    if cap >= 128 * 1024 * 1024:                       # v5e / v6e (128 MiB)
        return 100 * 1024 * 1024, 80 * 1024 * 1024
    return 48 * 1024 * 1024, 36 * 1024 * 1024          # v7x (64 MiB) / unknown


def _identity_masks(mp, m_true):
    """Full identity and identity restricted to the true (unpadded) rows."""
    row = lax.broadcasted_iota(jnp.int32, (mp, mp), 0)
    col = lax.broadcasted_iota(jnp.int32, (mp, mp), 1)
    eye_full = (row == col).astype(jnp.float32)
    diag_true = ((row == col) & (row < m_true)).astype(jnp.float32)
    return eye_full, diag_true


def _newton_schulz_scaled(s_raw, eye_full, diag_true, *, T, eps):
    """eps*I add, Frobenius normalization, T Newton-Schulz steps (in-kernel, f32).

    Returns B_T / sqrt(||S||_F): the final 1/sqrt(norm) is folded into the small
    m x m matrix so the big (m, n) result is never divided.  The first NS step is
    peeled analytically (B_0 = I  ->  B_1 = 1.5*I - 0.5*S).
    """
    s = s_raw + eps * diag_true
    inv_norm = lax.rsqrt(jnp.sum(s * s))               # 1 / ||S||_F  (EUP rsqrt)
    s = s * inv_norm
    if T >= 1:
        b = 1.5 * eye_full - 0.5 * s                   # peeled first iteration
        if T >= 2:
            def body(_, bt):
                b2 = jnp.dot(bt, bt, preferred_element_type=jnp.float32)
                b3 = jnp.dot(b2, bt, preferred_element_type=jnp.float32)
                return 1.5 * bt - 0.5 * jnp.dot(
                    b3, s, preferred_element_type=jnp.float32)
            b = lax.fori_loop(0, T - 1, body, b, unroll=True)
    else:
        b = eye_full
    return b * jnp.sqrt(inv_norm)                      # fold 1/sqrt(||S||_F) into B


# ---------------------------------------------------------------------------
# Path A: whole group(s) resident in VMEM (small / medium layers), one pass.
# ---------------------------------------------------------------------------
def _oni_monolith_kernel(z_ref, w_ref, *, T, eps, m_true, n_true):
    """Fused centering + Gram + Newton-Schulz + apply for gb groups per step.

    z_ref holds the RAW zero-padded weight block in the MXU input dtype; the row
    mean is computed in-kernel (f32 accumulation) and a column mask keeps padded
    columns of Zc exactly zero.  Padded rows of W come out exactly zero.
    """
    gb, mp, npad = z_ref.shape
    eye_full, diag_true = _identity_masks(mp, m_true)
    col_mask = lax.broadcasted_iota(jnp.int32, (mp, npad), 1) < n_true
    inv_n = 1.0 / float(n_true)

    def one_group(gi):
        z = z_ref[gi]                                          # (mp, npad)
        r = jnp.sum(z.astype(jnp.float32), axis=-1, keepdims=True)
        mu = (r * inv_n).astype(z.dtype)
        zc = jnp.where(col_mask, z - mu, jnp.zeros_like(z))    # padded cols stay 0
        # S = Zc @ Zc^T (contract the lane axis of both operands, f32 accumulate).
        s = lax.dot_general(zc, zc, (((1,), (1,)), ((), ())),
                            preferred_element_type=jnp.float32)
        b = _newton_schulz_scaled(s, eye_full, diag_true, T=T, eps=eps)
        w = jnp.dot(b.astype(z.dtype), zc, preferred_element_type=jnp.float32)
        w_ref[gi] = w.astype(w_ref.dtype)

    if gb <= 2:                                   # small static unroll
        for gi in range(gb):
            one_group(gi)
    else:                                         # bound live ranges with a loop
        def body(gi, carry):
            one_group(gi)
            return carry
        lax.fori_loop(0, gb, body, 0)


# ---------------------------------------------------------------------------
# Path B (large layers): stream Z over lane-dense n tiles.
#   call 1: pure streaming accumulation of the raw Gram S = Z Z^T and row sums r
#   (NS on the tiny (G, m, m) matrices happens in plain XLA, batched over G)
#   call 2: W = B @ Z - c,  c = B @ mu   (rank-1 centering correction)
# ---------------------------------------------------------------------------
def _oni_gram_kernel(z_ref, s_ref, r_ref, s_acc, r_acc):
    j = pl.program_id(1)

    @pl.when(j == 0)
    def _init():
        s_acc[...] = jnp.zeros_like(s_acc)
        r_acc[...] = jnp.zeros_like(r_acc)

    z = z_ref[0]                                               # (mp, tn)
    s_acc[...] += lax.dot_general(z, z, (((1,), (1,)), ((), ())),
                                  preferred_element_type=jnp.float32)
    r_acc[...] += jnp.sum(z.astype(jnp.float32), axis=-1, keepdims=True)

    @pl.when(j == pl.num_programs(1) - 1)
    def _finalize():
        s_ref[0] = s_acc[...]
        r_ref[0] = r_acc[...]


def _oni_apply_kernel(b_ref, c_ref, z_ref, w_ref):
    w = jnp.dot(b_ref[0], z_ref[0], preferred_element_type=jnp.float32)
    w_ref[0] = (w - c_ref[0]).astype(w_ref.dtype)


def _newton_schulz_xla(s_raw, r, *, T, eps, m_true, n_true, out_dtype):
    """Rank-1 centering correction + eps + normalization + NS, batched over G.

    Runs in plain XLA f32 on the tiny (G, m_pad, m_pad) matrices (keeps the
    streaming Pallas call free of the m^3 matmuls).  Returns B_T/sqrt(||S||_F)
    cast to the MXU dtype, and c = B @ mu used by the apply kernel.
    """
    mp = s_raw.shape[-1]
    mu = r * (1.0 / float(n_true))                             # (G, mp, 1) f32
    s = s_raw - mu * jnp.swapaxes(r, 1, 2)                     # S = ZZ^T - (1/n) r r^T
    row = lax.broadcasted_iota(jnp.int32, (mp, mp), 0)
    col = lax.broadcasted_iota(jnp.int32, (mp, mp), 1)
    eye_full = (row == col).astype(jnp.float32)
    diag_true = ((row == col) & (row < m_true)).astype(jnp.float32)
    s = s + eps * diag_true
    inv_norm = lax.rsqrt(jnp.sum(s * s, axis=(1, 2), keepdims=True))
    s = s * inv_norm
    hi = lax.Precision.HIGHEST                                 # keep NS math f32
    if T >= 1:
        b = 1.5 * eye_full - 0.5 * s                           # peeled first step
        for _ in range(T - 1):
            b2 = jnp.einsum("gij,gjk->gik", b, b, precision=hi)
            b3 = jnp.einsum("gij,gjk->gik", b2, b, precision=hi)
            b = 1.5 * b - 0.5 * jnp.einsum("gij,gjk->gik", b3, s, precision=hi)
    else:
        b = jnp.broadcast_to(eye_full, s.shape)
    b = b * jnp.sqrt(inv_norm)                                 # fold 1/sqrt(||S||_F)
    c = jnp.einsum("gij,gjk->gik", b, mu, precision=hi)        # (G, mp, 1) f32
    return b.astype(out_dtype), c


# ---------------------------------------------------------------------------
# Wrapper
# ---------------------------------------------------------------------------
def oni_norm(weight, T=5, norm_groups=1, eps=1e-5, *, mxu_bf16=True,
             max_monolith_bytes=None, tile_cols=None):
    """Pallas implementation of ONINorm.forward for a conv weight (OIHW)."""
    assert weight.shape[0] % norm_groups == 0
    G = norm_groups
    m = weight.shape[0] // G
    n = math.prod(weight.shape[1:])

    in_dtype = jnp.bfloat16 if mxu_bf16 else jnp.float32
    in_bytes = 2 if mxu_bf16 else 4

    m_pad = _round_up(m, 8)           # sublane alignment (padded rows stay 0)
    n128 = _round_up(n, 128)          # lane-dense last dim (unmasked vst)

    vmem_limit, vmem_budget = _vmem_sizes()
    mono_budget = vmem_budget if max_monolith_bytes is None else max_monolith_bytes

    # Single HBM pass in the wrapper: reshape + cast + zero-pad the RAW weight.
    # Centering is fused into the kernels, so no wrapper-side mean / subtract.
    z_raw = weight.reshape(G, m, n).astype(in_dtype)

    def monolith_bytes(gb, n_pad):
        io = 2 * gb * m_pad * n_pad * (in_bytes + 4)           # dbl-buffered in + out
        tmp = min(gb, 2) * m_pad * n_pad * (in_bytes + 8)      # zc + f32 temporaries
        return io + tmp + 12 * m_pad * m_pad * 4

    if monolith_bytes(1, n128) <= mono_budget:
        # ------------------- Path A: monolithic, groups batched per step -----
        # Keep >= min(G, 4) grid steps when G > 1 so neighbouring groups' DMAs
        # pipeline and megacore can shard the axis.
        min_steps = min(G, 4) if G > 1 else 1
        max_gb = max(1, G // min_steps)
        gb = 1
        for cand in range(min(max_gb, 8), 0, -1):
            if G % cand == 0 and monolith_bytes(cand, n128) <= mono_budget:
                gb = cand
                break
        n_pad = n128
        zp = jnp.pad(z_raw, ((0, 0), (0, m_pad - m), (0, n_pad - n)))

        cost = pl.CostEstimate(
            flops=int(G * (4 * m_pad * m_pad * n_pad
                           + 6 * max(T - 1, 0) * m_pad ** 3)),
            transcendentals=2 * G,
            bytes_accessed=int(G * m_pad * n_pad * (in_bytes + 4)))

        w_pad = pl.pallas_call(
            functools.partial(_oni_monolith_kernel, T=T, eps=eps,
                              m_true=m, n_true=n),
            out_shape=jax.ShapeDtypeStruct((G, m_pad, n_pad), jnp.float32),
            grid_spec=pltpu.PrefetchScalarGridSpec(
                num_scalar_prefetch=0,
                grid=(G // gb,),
                in_specs=[pl.BlockSpec((gb, m_pad, n_pad), lambda g: (g, 0, 0))],
                out_specs=pl.BlockSpec((gb, m_pad, n_pad), lambda g: (g, 0, 0)),
            ),
            compiler_params=pltpu.CompilerParams(
                dimension_semantics=("parallel",),
                vmem_limit_bytes=vmem_limit),
            cost_estimate=cost,
        )(zp)
    else:
        # ------------------- Path B: n-tiled streaming (bounded VMEM) --------
        if tile_cols is not None:
            tn = min(max(128, (tile_cols // 128) * 128), n128)
        else:
            # Divisor-aware tn: multiples of 128 under the per-gen VMEM budget,
            # preferring the candidate that minimizes padding past n128.
            per_col = 2 * m_pad * (in_bytes + 4)     # call-2 dbl-buffered z + w
            fixed = 16 * m_pad * m_pad * 4
            max_units = max(1, (vmem_budget - fixed) // (per_col * 128))
            max_units = int(min(max_units, 64, n128 // 128))
            best_key, tn = None, 128
            for u in range(1, max_units + 1):
                cand = 128 * u
                key = (_round_up(n, cand) - n128, -cand)
                if best_key is None or key < best_key:
                    best_key, tn = key, cand
        n_pad = _round_up(n, tn)
        n_tiles = n_pad // tn
        zp = jnp.pad(z_raw, ((0, 0), (0, m_pad - m), (0, n_pad - n)))

        # --- call 1: stream Z, accumulate raw Gram + row sums ----------------
        cost1 = pl.CostEstimate(
            flops=int(2 * G * m_pad * m_pad * n_pad),
            transcendentals=0,
            bytes_accessed=int(G * (m_pad * n_pad * in_bytes
                                    + m_pad * m_pad * 4 + m_pad * 4)))
        s_raw, r = pl.pallas_call(
            _oni_gram_kernel,
            out_shape=(jax.ShapeDtypeStruct((G, m_pad, m_pad), jnp.float32),
                       jax.ShapeDtypeStruct((G, m_pad, 1), jnp.float32)),
            grid_spec=pltpu.PrefetchScalarGridSpec(
                num_scalar_prefetch=0,
                grid=(G, n_tiles),
                in_specs=[pl.BlockSpec((1, m_pad, tn), lambda g, j: (g, 0, j))],
                out_specs=(pl.BlockSpec((1, m_pad, m_pad), lambda g, j: (g, 0, 0)),
                           pl.BlockSpec((1, m_pad, 1), lambda g, j: (g, 0, 0))),
                scratch_shapes=[pltpu.VMEM((m_pad, m_pad), jnp.float32),
                                pltpu.VMEM((m_pad, 1), jnp.float32)],
            ),
            compiler_params=pltpu.CompilerParams(
                dimension_semantics=("parallel", "arbitrary"),
                vmem_limit_bytes=vmem_limit),
            cost_estimate=cost1,
        )(zp)
        # TODO(synk): for G == 1 on v7x the two halves of this n reduction could
        # run on separate TensorCores (CORE_PARALLEL chunk axis) and be combined
        # here before the XLA Newton-Schulz.

        # --- Newton-Schulz on the tiny (G, mp, mp) matrices in plain XLA ------
        b_mat, c_vec = _newton_schulz_xla(s_raw, r, T=T, eps=eps, m_true=m,
                                          n_true=n, out_dtype=in_dtype)

        # --- call 2: W = B @ Z - c, tiled over n, both axes parallel ----------
        cost2 = pl.CostEstimate(
            flops=int(2 * G * m_pad * m_pad * n_pad),
            transcendentals=0,
            bytes_accessed=int(G * (m_pad * n_pad * (in_bytes + 4)
                                    + m_pad * m_pad * in_bytes)))
        w_pad = pl.pallas_call(
            _oni_apply_kernel,
            out_shape=jax.ShapeDtypeStruct((G, m_pad, n_pad), jnp.float32),
            grid_spec=pltpu.PrefetchScalarGridSpec(
                num_scalar_prefetch=0,
                grid=(G, n_tiles),
                in_specs=[pl.BlockSpec((1, m_pad, m_pad), lambda g, j: (g, 0, 0)),
                          pl.BlockSpec((1, m_pad, 1), lambda g, j: (g, 0, 0)),
                          pl.BlockSpec((1, m_pad, tn), lambda g, j: (g, 0, j))],
                out_specs=pl.BlockSpec((1, m_pad, tn), lambda g, j: (g, 0, j)),
            ),
            compiler_params=pltpu.CompilerParams(
                dimension_semantics=("parallel", "parallel"),
                vmem_limit_bytes=vmem_limit),
            cost_estimate=cost2,
        )(b_mat, c_vec, zp)

    return w_pad[:, :m, :n].reshape(weight.shape).astype(weight.dtype)


# ---------------------------------------------------------------------------
# Pure-JAX reference mirroring the PyTorch forward, for validation only.
# ---------------------------------------------------------------------------
def _oni_norm_ref(weight, T=5, norm_groups=1, eps=1e-5):
    c_out = weight.shape[0]
    z = weight.reshape(norm_groups, c_out // norm_groups, -1).astype(jnp.float32)
    zc = z - jnp.mean(z, axis=-1, keepdims=True)
    s = jnp.einsum("gmn,gkn->gmk", zc, zc)
    eye = jnp.eye(s.shape[-1], dtype=s.dtype)[None]
    s = s + eps * eye
    norm_s = jnp.sqrt(jnp.sum(s * s, axis=(1, 2), keepdims=True))
    s = s / norm_s
    b = jnp.broadcast_to(eye, s.shape)
    for _ in range(T):
        b3 = jnp.einsum("gij,gjk->gik", jnp.einsum("gij,gjk->gik", b, b), b)
        b = 1.5 * b - 0.5 * jnp.einsum("gij,gjk->gik", b3, s)
    w = jnp.einsum("gij,gjk->gik", b, zc) / jnp.sqrt(norm_s)
    return w.reshape(weight.shape).astype(weight.dtype)


def _rel_fro_err(a, b):
    a = a.astype(jnp.float32).ravel()
    b = b.astype(jnp.float32).ravel()
    return jnp.linalg.norm(a - b) / jnp.linalg.norm(b)


if __name__ == "__main__":
    key = jax.random.PRNGKey(0)
    k1, k2, k3 = jax.random.split(key, 3)

    oni = jax.jit(oni_norm, static_argnames=(
        "T", "norm_groups", "eps", "mxu_bf16", "max_monolith_bytes", "tile_cols"))

    # Case 1: small conv weight OIHW=(16,8,3,3), 2 groups -> monolithic Path A
    # with a 2-step grid (one group per step).
    w1 = jax.random.normal(k1, (16, 8, 3, 3), dtype=jnp.float32)
    ref1 = _oni_norm_ref(w1, T=5, norm_groups=2)

    out1 = jax.block_until_ready(oni(w1, T=5, norm_groups=2))   # bf16 MXU (default)
    assert out1.shape == w1.shape and out1.dtype == w1.dtype
    assert float(_rel_fro_err(out1, ref1)) < 2e-2

    out1_f32 = jax.block_until_ready(oni(w1, T=5, norm_groups=2, mxu_bf16=False))
    assert jnp.allclose(out1_f32, ref1, rtol=1e-3, atol=1e-3)

    # Case 2: force the n-tiled streaming Path B (the large-layer path) on a
    # small weight so both pallas_calls + the XLA Newton-Schulz are exercised.
    w2 = jax.random.normal(k2, (32, 16, 3, 3), dtype=jnp.float32)
    ref2 = _oni_norm_ref(w2, T=5, norm_groups=1)

    out2_f32 = jax.block_until_ready(
        oni(w2, T=5, norm_groups=1, mxu_bf16=False,
            max_monolith_bytes=0, tile_cols=128))
    assert jnp.allclose(out2_f32, ref2, rtol=1e-3, atol=1e-3)

    out2 = jax.block_until_ready(
        oni(w2, T=5, norm_groups=1, max_monolith_bytes=0, tile_cols=128))
    assert float(_rel_fro_err(out2, ref2)) < 2e-2

    # Case 3: ragged m (m=6 -> padded to 8) and tiny n (27 -> padded to 128);
    # verifies the fused centering + zero-padding is exact in f32.
    w3 = jax.random.normal(k3, (12, 3, 3, 3), dtype=jnp.float32)
    ref3 = _oni_norm_ref(w3, T=5, norm_groups=2)
    out3 = jax.block_until_ready(oni(w3, T=5, norm_groups=2, mxu_bf16=False))
    assert jnp.allclose(out3, ref3, rtol=1e-3, atol=1e-3)

    print("KERNEL_OK")
</pallas_src>

<mosaic_0001>
module attributes {stable_mosaic.version = 11 : i64} {
  func.func @_oni_monolith_kernel(%arg0: i32, %arg1: memref<1x8x128xbf16, #tpu.memory_space<vmem>>, %arg2: memref<1x8x128xf32, #tpu.memory_space<vmem>>) attributes {dimension_semantics = [#tpu.dimension_semantics<parallel>], iteration_bounds = array<i64: 2>, scalar_prefetch = 0 : i64, scratch_operands = 0 : i64, tpu.core_type = #tpu.core_type<tc>, window_params = [{transform_indices = @transform_0, window_bounds = array<i64: 1, 8, 128>}, {transform_indices = @transform_1, window_bounds = array<i64: 1, 8, 128>}]} {
    %0 = tpu.iota {dimensions = array<i32: 0>} : vector<8x8xi32>
    %1 = tpu.iota {dimensions = array<i32: 1>} : vector<8x8xi32>
    %2 = arith.cmpi eq, %0, %1 : vector<8x8xi32>
    %3 = arith.extui %2 : vector<8x8xi1> to vector<8x8xi32>
    %4 = arith.sitofp %3 : vector<8x8xi32> to vector<8x8xf32>
    %5 = arith.cmpi eq, %0, %1 : vector<8x8xi32>
    %c8_i32 = arith.constant 8 : i32
    %6 = vector.broadcast %c8_i32 : i32 to vector<8x8xi32>
    %7 = arith.cmpi slt, %0, %6 : vector<8x8xi32>
    %8 = arith.andi %5, %7 : vector<8x8xi1>
    %9 = arith.extui %8 : vector<8x8xi1> to vector<8x8xi32>
    %10 = arith.sitofp %9 : vector<8x8xi32> to vector<8x8xf32>
    %11 = tpu.iota {dimensions = array<i32: 1>} : vector<8x128xi32>
    %c72_i32 = arith.constant 72 : i32
    %12 = vector.broadcast %c72_i32 : i32 to vector<8x128xi32>
    %13 = arith.cmpi slt, %11, %12 : vector<8x128xi32>
    %c0 = arith.constant 0 : index
    %c0_0 = arith.constant 0 : index
    %c0_1 = arith.constant 0 : index
    %14 = vector.load %arg1[%c0, %c0_0, %c0_1] : memref<1x8x128xbf16, #tpu.memory_space<vmem>>, vector<1x8x128xbf16>
    %15 = vector.shape_cast %14 : vector<1x8x128xbf16> to vector<8x128xbf16>
    %16 = arith.extf %15 : vector<8x128xbf16> to vector<8x128xf32>
    %cst = arith.constant dense<0.000000e+00> : vector<8xf32>
    %17 = vector.multi_reduction <add>, %16, %cst [1] : vector<8x128xf32> to vector<8xf32>
    %18 = vector.shape_cast %17 : vector<8xf32> to vector<8x1xf32>
    %cst_2 = arith.constant 0.013888889 : f32
    %19 = vector.broadcast %cst_2 : f32 to vector<8x1xf32>
    %20 = arith.mulf %18, %19 : vector<8x1xf32>
    %21 = arith.truncf %20 : vector<8x1xf32> to vector<8x1xbf16>
    %22 = vector.broadcast %21 : vector<8x1xbf16> to vector<8x128xbf16>
    %23 = arith.subf %15, %22 : vector<8x128xbf16>
    %cst_3 = arith.constant 0.000000e+00 : bf16
    %24 = vector.broadcast %cst_3 : bf16 to vector<8x128xbf16>
    %25 = arith.select %13, %23, %24 : vector<8x128xi1>, vector<8x128xbf16>
    %cst_4 = arith.constant dense<0.000000e+00> : vector<8x8xf32>
    %26 = tpu.matmul %25, %25, %cst_4 {dimension_numbers = #tpu.dot_dimension_numbers<[1], [1], [0], [0], [0, 0, 1, 0], [], []>} : vector<8x128xbf16>, vector<8x128xbf16>, vector<8x8xf32> -> vector<8x8xf32>
    %cst_5 = arith.constant 9.99999974E-6 : f32
    %27 = vector.broadcast %cst_5 : f32 to vector<8x8xf32>
    %28 = arith.mulf %27, %10 : vector<8x8xf32>
    %29 = arith.addf %26, %28 : vector<8x8xf32>
    %30 = arith.mulf %29, %29 : vector<8x8xf32>
    %31 = vector.shape_cast %30 : vector<8x8xf32> to vector<1x8x8xf32>
    %cst_6 = arith.constant dense<0.000000e+00> : vector<1xf32>
    %32 = vector.multi_reduction <add>, %31, %cst_6 [1, 2] : vector<1x8x8xf32> to vector<1xf32>
    %33 = vector.shape_cast %32 : vector<1xf32> to vector<1x1x1xf32>
    %34 = vector.extract %33[0, 0, 0] : f32 from vector<1x1x1xf32>
    %35 = math.rsqrt %34 : f32
    %36 = vector.broadcast %35 : f32 to vector<8x8xf32>
    %37 = arith.mulf %29, %36 : vector<8x8xf32>
    %cst_7 = arith.constant 1.500000e+00 : f32
    %38 = vector.broadcast %cst_7 : f32 to vector<8x8xf32>
    %39 = arith.mulf %38, %4 : vector<8x8xf32>
    %cst_8 = arith.constant 5.000000e-01 : f32
    %40 = vector.broadcast %cst_8 : f32 to vector<8x8xf32>
    %41 = arith.mulf %40, %37 : vector<8x8xf32>
    %42 = arith.subf %39, %41 : vector<8x8xf32>
    %c0_i32 = arith.constant 0 : i32
    %cst_9 = arith.constant dense<0.000000e+00> : vector<8x8xf32>
    %43 = tpu.matmul %42, %42, %cst_9 {dimension_numbers = #tpu.dot_dimension_numbers<[1], [0], [0], [1], [0, 0, 1, 1], [], []>} : vector<8x8xf32>, vector<8x8xf32>, vector<8x8xf32> -> vector<8x8xf32>
    %cst_10 = arith.constant dense<0.000000e+00> : vector<8x8xf32>
    %44 = tpu.matmul %43, %42, %cst_10 {dimension_numbers = #tpu.dot_dimension_numbers<[1], [0], [0], [1], [0, 0, 1, 1], [], []>} : vector<8x8xf32>, vector<8x8xf32>, vector<8x8xf32> -> vector<8x8xf32>
    %cst_11 = arith.constant 1.500000e+00 : f32
    %45 = vector.broadcast %cst_11 : f32 to vector<8x8xf32>
    %46 = arith.mulf %45, %42 : vector<8x8xf32>
    %cst_12 = arith.constant dense<0.000000e+00> : vector<8x8xf32>
    %47 = tpu.matmul %44, %37, %cst_12 {dimension_numbers = #tpu.dot_dimension_numbers<[1], [0], [0], [1], [0, 0, 1, 1], [], []>} : vector<8x8xf32>, vector<8x8xf32>, vector<8x8xf32> -> vector<8x8xf32>
    %cst_13 = arith.constant 5.000000e-01 : f32
    %48 = vector.broadcast %cst_13 : f32 to vector<8x8xf32>
    %49 = arith.mulf %48, %47 : vector<8x8xf32>
    %50 = arith.subf %46, %49 : vector<8x8xf32>
    %c1_i32 = arith.constant 1 : i32
    %cst_14 = arith.constant dense<0.000000e+00> : vector<8x8xf32>
    %51 = tpu.matmul %50, %50, %cst_14 {dimension_numbers = #tpu.dot_dimension_numbers<[1], [0], [0], [1], [0, 0, 1, 1], [], []>} : vector<8x8xf32>, vector<8x8xf32>, vector<8x8xf32> -> vector<8x8xf32>
    %cst_15 = arith.constant dense<0.000000e+00> : vector<8x8xf32>
    %52 = tpu.matmul %51, %50, %cst_15 {dimension_numbers = #tpu.dot_dimension_numbers<[1], [0], [0], [1], [0, 0, 1, 1], [], []>} : vector<8x8xf32>, vector<8x8xf32>, vector<8x8xf32> -> vector<8x8xf32>
    %cst_16 = arith.constant 1.500000e+00 : f32
    %53 = vector.broadcast %cst_16 : f32 to vector<8x8xf32>
    %54 = arith.mulf %53, %50 : vector<8x8xf32>
    %cst_17 = arith.constant dense<0.000000e+00> : vector<8x8xf32>
    %55 = tpu.matmul %52, %37, %cst_17 {dimension_numbers = #tpu.dot_dimension_numbers<[1], [0], [0], [1], [0, 0, 1, 1], [], []>} : vector<8x8xf32>, vector<8x8xf32>, vector<8x8xf32> -> vector<8x8xf32>
    %cst_18 = arith.constant 5.000000e-01 : f32
    %56 = vector.broadcast %cst_18 : f32 to vector<8x8xf32>
    %57 = arith.mulf %56, %55 : vector<8x8xf32>
    %58 = arith.subf %54, %57 : vector<8x8xf32>
    %c2_i32 = arith.constant 2 : i32
    %cst_19 = arith.constant dense<0.000000e+00> : vector<8x8xf32>
    %59 = tpu.matmul %58, %58, %cst_19 {dimension_numbers = #tpu.dot_dimension_numbers<[1], [0], [0], [1], [0, 0, 1, 1], [], []>} : vector<8x8xf32>, vector<8x8xf32>, vector<8x8xf32> -> vector<8x8xf32>
    %cst_20 = arith.constant dense<0.000000e+00> : vector<8x8xf32>
    %60 = tpu.matmul %59, %58, %cst_20 {dimension_numbers = #tpu.dot_dimension_numbers<[1], [0], [0], [1], [0, 0, 1, 1], [], []>} : vector<8x8xf32>, vector<8x8xf32>, vector<8x8xf32> -> vector<8x8xf32>
    %cst_21 = arith.constant 1.500000e+00 : f32
    %61 = vector.broadcast %cst_21 : f32 to vector<8x8xf32>
    %62 = arith.mulf %61, %58 : vector<8x8xf32>
    %cst_22 = arith.constant dense<0.000000e+00> : vector<8x8xf32>
    %63 = tpu.matmul %60, %37, %cst_22 {dimension_numbers = #tpu.dot_dimension_numbers<[1], [0], [0], [1], [0, 0, 1, 1], [], []>} : vector<8x8xf32>, vector<8x8xf32>, vector<8x8xf32> -> vector<8x8xf32>
    %cst_23 = arith.constant 5.000000e-01 : f32
    %64 = vector.broadcast %cst_23 : f32 to vector<8x8xf32>
    %65 = arith.mulf %64, %63 : vector<8x8xf32>
    %66 = arith.subf %62, %65 : vector<8x8xf32>
    %c3_i32 = arith.constant 3 : i32
    %cst_24 = arith.constant dense<0.000000e+00> : vector<8x8xf32>
    %67 = tpu.matmul %66, %66, %cst_24 {dimension_numbers = #tpu.dot_dimension_numbers<[1], [0], [0], [1], [0, 0, 1, 1], [], []>} : vector<8x8xf32>, vector<8x8xf32>, vector<8x8xf32> -> vector<8x8xf32>
    %cst_25 = arith.constant dense<0.000000e+00> : vector<8x8xf32>
    %68 = tpu.matmul %67, %66, %cst_25 {dimension_numbers = #tpu.dot_dimension_numbers<[1], [0], [0], [1], [0, 0, 1, 1], [], []>} : vector<8x8xf32>, vector<8x8xf32>, vector<8x8xf32> -> vector<8x8xf32>
    %cst_26 = arith.constant 1.500000e+00 : f32
    %69 = vector.broadcast %cst_26 : f32 to vector<8x8xf32>
    %70 = arith.mulf %69, %66 : vector<8x8xf32>
    %cst_27 = arith.constant dense<0.000000e+00> : vector<8x8xf32>
    %71 = tpu.matmul %68, %37, %cst_27 {dimension_numbers = #tpu.dot_dimension_numbers<[1], [0], [0], [1], [0, 0, 1, 1], [], []>} : vector<8x8xf32>, vector<8x8xf32>, vector<8x8xf32> -> vector<8x8xf32>
    %cst_28 = arith.constant 5.000000e-01 : f32
    %72 = vector.broadcast %cst_28 : f32 to vector<8x8xf32>
    %73 = arith.mulf %72, %71 : vector<8x8xf32>
    %74 = arith.subf %70, %73 : vector<8x8xf32>
    %75 = math.sqrt %35 : f32
    %76 = vector.broadcast %75 : f32 to vector<8x8xf32>
    %77 = arith.mulf %74, %76 : vector<8x8xf32>
    %78 = arith.truncf %77 : vector<8x8xf32> to vector<8x8xbf16>
    %cst_29 = arith.constant dense<0.000000e+00> : vector<8x128xf32>
    %79 = tpu.matmul %78, %25, %cst_29 {dimension_numbers = #tpu.dot_dimension_numbers<[1], [0], [0], [1], [0, 0, 1, 1], [], []>} : vector<8x8xbf16>, vector<8x128xbf16>, vector<8x128xf32> -> vector<8x128xf32>
    %c0_30 = arith.constant 0 : index
    %c0_31 = arith.constant 0 : index
    %c0_32 = arith.constant 0 : index
    %80 = vector.load %arg2[%c0_30, %c0_31, %c0_32] : memref<1x8x128xf32, #tpu.memory_space<vmem>>, vector<1x8x128xf32>
    %81 = vector.shape_cast %80 : vector<1x8x128xf32> to vector<8x128xf32>
    %82 = vector.shape_cast %79 : vector<8x128xf32> to vector<1x8x128xf32>
    tpu.vector_store %arg2[%c0_30, %c0_31, %c0_32], %82 {strides = array<i32>} : memref<1x8x128xf32, #tpu.memory_space<vmem>>, vector<1x8x128xf32>,
    return
  }
  func.func @transform_0(%arg0: i32) -> (i32, i32, i32) {
    %c0_i32 = arith.constant 0 : i32
    %c0_i32_0 = arith.constant 0 : i32
    %c0_i32_1 = arith.constant 0 : i32
    return %arg0, %c0_i32, %c0_i32_0 : i32, i32, i32
  }
  func.func @transform_1(%arg0: i32) -> (i32, i32, i32) {
    %c0_i32 = arith.constant 0 : i32
    %c0_i32_0 = arith.constant 0 : i32
    %c0_i32_1 = arith.constant 0 : i32
    return %arg0, %c0_i32, %c0_i32_0 : i32, i32, i32
  }
}

</mosaic_0001>

<bundles_post_ra>
// kernel: oni_norm.1
= control target key start
LH: loop header
LB: loop body
LE: loop exit
PB: predicated region body
PF: predicated region fallthrough
CT: control target
= control target key end

     0   :  { %s620_s6 = smov 0   ;;  %s660_s0 = inlined_call_operand.vmem [shape: bf16[2,8,128], index: 0, kind: input, shape index: {}]   ;;  %s661_s1 = inlined_call_operand.vmem [shape: f32[2,8,128], index: 1, kind: output, shape index: {}]  }
   0x1 LB: > { %s558_s7 = sadd.s32 4294967295, %s607_s6   ;;  %p562_p0 = scmp.ge.s32.totalorder %s607_s6, 1  ;;  %s607_s6 = sphi %s620_s6, %s11_s6  }
   0x2   : > { %p86_p1 = scmp.lt.s32.totalorder %s607_s6, 3 }
   0x4   : > { %p87_p2 = pnand %p562_p0, %p86_p1 }
   0x5   : > { %p104_p3 = scmp.lt.s32.totalorder (!%p87_p2), %s558_s7, 1 }
   0x6   : > { %90 = sbr.rel (%p87_p2) target bundleno = 2248 (0x8c8), region = 24 }
   0xb   : > { %s663_s7 = smov (!%p104_p3, %s558_s7), 1  ;;  %v113_v2 = vlaneseq  ;;  %v609_v12 = vmov 0.0   ;;  %vm151_vm3 = vcmask 64512   ;;  %vm487_vm9 = vcmask 1043456  }
   0xc   : > { %s563_s8 = sshll.u32 %s663_s7, 2  ;;  %s564_s15 = sshll.u32 %s663_s7, 3 }
   0xd   : > { %s107_s11 = scalar_lea.vmem %s660_s0, %s563_s8  ;;  %v116_v3 = vand.u32 127, %v113_v2  ;;  %v114_v4 = vshrl.u32 %v113_v2, 7  ;;  %s111_s18 = scalar_lea.vmem %s661_s1, %s564_s15 }
   0xe   : > { %v125_v0 = vld [vmem:[%s107_s11] sm:$0xf] }
   0xf   : > { %v126_v1 = vunpack.c.l.bf16 %v125_v0  ;;  %vm117_vm0 = vcmp.eq.s32.totalorder %v114_v4, %v116_v3  ;;  %vm124_vm1 = vcmp.lt.s32.totalorder %v116_v3, 72 }
  0x10   : > { %vm134_vm2 = vmpackc.low %vm124_vm1, %vm124_vm1  ;;  %v565_v13 = vsel %vm117_vm0, 1.0, %v609_v12 }
  0x11   : > { %127 = vadd.xlane.f32.xlu0 %v126_v1  ;;  %v136_v14 = vmul.f32 1e-05, %v565_v13  ;;  %v176_v36 = vmul.f32 1.5, %v565_v13 }
  0x84   : > { %v128_v5 = vpop.xlane.xlu0 %127 }
  0x85   : > { %v129_v6 = vmul.f32 0.013888889, %v128_v5 }
  0x87   : > { %v130_v7 = vpack.c.bf16 %v129_v6, %v129_v6 }
  0x89   : > { %v131_v8 = vunpack.c.l.bf16 %v130_v7 }
  0x8b   : > { %v132_v9 = vsub.f32 %v126_v1, %v131_v8 }
  0x8d   : > { %v133_v10 = vpack.c.bf16 %v132_v9, %v132_v9 }
  0x8f   : > { %v634_v11 = vsel %vm134_vm2, %v133_v10, 0 }
  0x90   : > { %144 = vmatpush.bf16.xpose.msra.mxu0 %v634_v11  ;;  %v489_v58 = vsel %vm487_vm9, %v634_v11, 0 }
  0x97   : > { %145 = vmatmul.bf16.vlgmr.msra.gmra.mxu0 %v634_v11 }
 0x114   : > { %v146_v15 = vpop.f32.mrf.mxu0 }
 0x115   : > { %v147_v16 = vadd.f32 %v146_v15, %v136_v14 }
 0x117   : > { %v150_v17 = vmul.f32 %v147_v16, %v147_v16 }
 0x119   : > { %v152_v18 = vsel %vm151_vm3, %v150_v17, 0.0 }
 0x11a   : > { %153 = vadd.xlane.f32.xlu0 %v152_v18 }
 0x11c   : > { %v148_v19 = vpop.f32.mrf.mxu0 }
 0x18d   : > { %v154_v20 = vpop.xlane.xlu0 %153 }
 0x18e   : > { %v155_v21 = vrot.slane %v154_v20, 4 }
 0x190   : > { %v156_v22 = vadd.f32 %v155_v21, %v154_v20 }
 0x192   : > { %v157_v23 = vrot.slane %v156_v22, 2 }
 0x194   : > { %v158_v24 = vadd.f32 %v157_v23, %v156_v22 }
 0x196   : > { %v159_v25 = vrot.slane %v158_v24, 1 }
 0x198   : > { %v160_v26 = vadd.f32 %v159_v25, %v158_v24 }
 0x19a   : > { %582 = vpush %v160_v26 }
 0x1cb   : > { %s583_s12 = spop %582 }
 0x1cc   : > { %v162_v27 = vstv %s583_s12 }
 0x1cd   : > { %597 = vrsqrt.f32 %v162_v27  ;;  %vm169_vm5 = vweird.f32 %v162_v27 }
 0x1d3   : > { %v598_v28 = vpop.eup %597 }
 0x1d4   : > { %v164_v29 = vmul.f32 %v598_v28, %v162_v27  ;;  %vm170_vm4 = vweird.f32 %v598_v28 }
 0x1d5   : > { %vm171_vm6 = vmor %vm169_vm5, %vm170_vm4 }
 0x1d6   : > { %v165_v30 = vmul.f32 %v598_v28, %v164_v29 }
 0x1d8   : > { %v166_v31 = vmul.f32 0.5, %v165_v30 }
 0x1da   : > { %v167_v32 = vsub.f32 1.5, %v166_v31 }
 0x1dc   : > { %v168_v33 = vmul.f32 %v598_v28, %v167_v32 }
 0x1de   : > { %v172_v34 = vsel %vm171_vm6, %v598_v28, %v168_v33 }
 0x1df   : > { %584 = vpush %v172_v34 }
 0x210   : > { %s585_s13 = spop %584 }
 0x211   : > { %v174_v35 = vstv %s585_s13 }
 0x212   : > { %599 = vrsqrt.f32 %v174_v35  ;;  %v175_v37 = vmul.f32 %v174_v35, %v147_v16  ;;  %vm475_vm7 = vcmp.eq.f32.partialorder %v174_v35, inf  ;;  %v478_v47 = vand.u32 2147483648, %v174_v35 }
 0x213   : > { %vm477_vm8 = vcmp.eq.f32.partialorder %v174_v35, 0.0 }
 0x214   : > { %244 = vmatpush.msrb.mxu0 %v175_v37  ;;  %316 = vmatpush.msra.mxu3 %v175_v37  ;;  %v177_v38 = vmul.f32 0.5, %v175_v37 }
 0x216   : > { %388 = vmatpush.msrb.mxu3 %v175_v37  ;;  %v178_v39 = vsub.f32 %v176_v36, %v177_v38 }
 0x218   : > { %v600_v40 = vpop.eup %599  ;;  %197 = vmatpush.msra.mxu1 %v178_v39  ;;  %220 = vmatpush.msra.mxu2 %v178_v39  ;;  %v225_v53 = vmul.f32 1.5, %v178_v39 }
 0x219   : > { %567 = vmatmul.msk.f32.vlgmr.msra.gmra.mxu1 %vm151_vm3, %v178_v39  ;;  %v469_v41 = vmul.f32 %v600_v40, %v174_v35 }
 0x21b   : > { %v470_v42 = vmul.f32 %v600_v40, %v469_v41 }
 0x21d   : > { %v471_v43 = vmul.f32 0.5, %v470_v42 }
 0x21f   : > { %v472_v44 = vsub.f32 1.5, %v471_v43 }
 0x221   : > { %v473_v45 = vmul.f32 %v600_v40, %v472_v44 }
 0x223   : > { %v474_v46 = vmul.f32 %v473_v45, %v174_v35 }
 0x225   : > { %v476_v48 = vsel %vm475_vm7, %v174_v35, %v474_v46 }
 0x226   : > { %v479_v49 = vsel %vm477_vm8, %v478_v47, %v476_v48 }
 0x227   : > { %586 = vpush %v479_v49 }
 0x258   : > { %s587_s14 = spop %586 }
 0x259   : > { %v481_v11 = vstv %s587_s14 }
 0x296   : > { %v199_v50 = vpop.f32.mrf.mxu1 }
 0x297   : > { %568 = vmatmul.msk.f32.vlgmr.msra.gmra.mxu2 %vm151_vm3, %v199_v50 }
 0x31a   : > { %v222_v51 = vpop.f32.mrf.mxu2 }
 0x31b   : > { %569 = vmatmul.msk.f32.vlgmr.msrb.gmra.mxu0 %vm151_vm3, %v222_v51 }
 0x398   : > { %v246_v52 = vpop.f32.mrf.mxu0 }
 0x399   : > { %v249_v54 = vmul.f32 0.5, %v246_v52 }
 0x39b   : > { %v250_v55 = vsub.f32 %v225_v53, %v249_v54 }
 0x39d   : > { %269 = vmatpush.msrb.mxu1 %v250_v55  ;;  %292 = vmatpush.msrb.mxu2 %v250_v55  ;;  %v297_v60 = vmul.f32 1.5, %v250_v55 }
 0x39e   : > { %570 = vmatmul.msk.f32.vlgmr.msrb.gmra.mxu1 %vm151_vm3, %v250_v55 }
 0x41b   : > { %v271_v56 = vpop.f32.mrf.mxu1 }
 0x41c   : > { %571 = vmatmul.msk.f32.vlgmr.msrb.gmra.mxu2 %vm151_vm3, %v271_v56 }
 0x49f   : > { %v294_v57 = vpop.f32.mrf.mxu2 }
 0x4a0   : > { %572 = vmatmul.msk.f32.vlgmr.msra.gmra.mxu3 %vm151_vm3, %v294_v57 }
 0x4a1   : > { %498 = vmatpush.bf16.msra.mxu3 %v489_v58 }
 0x523   : > { %v318_v59 = vpop.f32.mrf.mxu3 }
 0x524   : > { %v321_v61 = vmul.f32 0.5, %v318_v59 }
 0x526   : > { %v322_v62 = vsub.f32 %v297_v60, %v321_v61 }
 0x528   : > { %341 = vmatpush.msra.mxu1 %v322_v62  ;;  %364 = vmatpush.msra.mxu2 %v322_v62  ;;  %v369_v2 = vmul.f32 1.5, %v322_v62 }
 0x529   : > { %573 = vmatmul.msk.f32.vlgmr.msra.gmra.mxu1 %vm151_vm3, %v322_v62 }
 0x52a   : > { %460 = vmatpush.msrb.mxu2 %v175_v37 }
 0x5a6   : > { %v343_v63 = vpop.f32.mrf.mxu1 }
 0x5a7   : > { %574 = vmatmul.msk.f32.vlgmr.msra.gmra.mxu2 %vm151_vm3, %v343_v63 }
 0x62a   : > { %v366_v0 = vpop.f32.mrf.mxu2 }
 0x62b   : > { %575 = vmatmul.msk.f32.vlgmr.msrb.gmra.mxu3 %vm151_vm3, %v366_v0 }
 0x6ae   : > { %v390_v1 = vpop.f32.mrf.mxu3 }
 0x6af   : > { %v393_v3 = vmul.f32 0.5, %v390_v1 }
 0x6b1   : > { %v394_v4 = vsub.f32 %v369_v2, %v393_v3 }
 0x6b3   : > { %413 = vmatpush.msra.mxu0 %v394_v4  ;;  %436 = vmatpush.msrb.mxu1 %v394_v4  ;;  %v441_v8 = vmul.f32 1.5, %v394_v4 }
 0x6b4   : > { %576 = vmatmul.msk.f32.vlgmr.msra.gmra.mxu0 %vm151_vm3, %v394_v4 }
 0x731   : > { %v415_v5 = vpop.f32.mrf.mxu0 }
 0x732   : > { %577 = vmatmul.msk.f32.vlgmr.msrb.gmra.mxu1 %vm151_vm3, %v415_v5 }
 0x7af   : > { %v438_v6 = vpop.f32.mrf.mxu1 }
 0x7b0   : > { %578 = vmatmul.msk.f32.vlgmr.msrb.gmra.mxu2 %vm151_vm3, %v438_v6 }
 0x833   : > { %v462_v7 = vpop.f32.mrf.mxu2 }
 0x834   : > { %v465_v9 = vmul.f32 0.5, %v462_v7 }
 0x836   : > { %v466_v10 = vsub.f32 %v441_v8, %v465_v9 }
 0x838   : > { %v482_v12 = vmul.f32 %v481_v11, %v466_v10 }
 0x83a   : > { %v483_v13 = vpack.c.bf16 %v482_v12, %v482_v12 }
 0x83c   : > { %579 = vmatmul.msk.bf16.vlgmr.msra.gmra.mxu3 %vm151_vm3, %v483_v13 }
 0x8bf   : > { %v500_v14 = vpop.f32.mrf.mxu3 }
 0x8c0   : > { %504 = vst [vmem:[%s111_s18] sm:$0xff] %v500_v14 }
 0x8c7   : > { %v502_v15 = vpop.f32.mrf.mxu3 }
 0x8c8 PF: > { %s11_s6 = sadd.s32 1, %s607_s6  }
 0x8c9   : > { %p8_p4 = scmp.ge.s32.totalorder %s11_s6, 4  }
 0x8cb   :  { %10 = sbr.rel (!%p8_p4) target bundleno = 1 (0x1), region = 54 }

</bundles_post_ra>
